<compile_context>
chip_gen: v7x
topology: tpu7x:2x2x1
jax: 0.10.0
libtpu: 0.0.40
codegen_flags: <defaults>
</compile_context>

<pallas_src>
import math
import jax
import jax.numpy as jnp
from jax.experimental import pallas as pl
from jax.experimental.pallas import tpu as pltpu

IN_DIM = 6      # now_state(3) ++ rel_dis(3)
HID1 = 32
HID2 = 32
OUT_DIM = 3
ROW_ALIGN = 128


def _round_up(x, m):
    return (x + m - 1) // m * m


def _elu(x):
    # ELU(alpha=1): x if x > 0 else exp(x)-1.  min() keeps the discarded branch finite.
    return jnp.where(x > 0.0, x, jnp.exp(jnp.minimum(x, 0.0)) - 1.0)


def _mlp_kernel(now_ref, rel_ref, p1_ref, p2_ref, p3_ref, o_ref):
    # Batch on the sublane (second-minor) axis; features on lanes.  No transposes.
    now = now_ref[...]                        # (bt, 3)
    rel = rel_ref[...]                        # (bt, 3)

    # Layer 1: two small dots replace the concat([now, rel]) @ W1.T
    w1a = p1_ref[0:3, :]                      # (3, 32)
    w1b = p1_ref[3:6, :]                      # (3, 32)
    b1 = p1_ref[6:7, :]                       # (1, 32)
    h1 = (jnp.dot(now, w1a, preferred_element_type=jnp.float32)
          + jnp.dot(rel, w1b, preferred_element_type=jnp.float32)
          + b1)                               # (bt, 32)
    h1 = _elu(h1)

    # Layer 2
    w2 = p2_ref[0:HID1, :]                    # (32, 32)
    b2 = p2_ref[HID1:HID1 + 1, :]             # (1, 32)
    h2 = _elu(jnp.dot(h1, w2, preferred_element_type=jnp.float32) + b2)

    # Layer 3 + output nonlinearity: sigmoid(y)*2 - 1 == tanh(y/2)
    w3 = p3_ref[0:HID2, :]                    # (32, 3)
    b3 = p3_ref[HID2:HID2 + 1, :]             # (1, 3)
    y = jnp.dot(h2, w3, preferred_element_type=jnp.float32) + b3
    o_ref[...] = jnp.tanh(0.5 * y).astype(o_ref.dtype)


def _choose_batch_tile(B, batch_tile):
    # Target ~4 grid steps (so v7x's two TensorCores both get work and the
    # pipeline has something to overlap), 128-row aligned, capped at batch_tile.
    bt = _round_up(max(pl.cdiv(B, 4), 1), ROW_ALIGN)
    bt = min(bt, _round_up(max(batch_tile, ROW_ALIGN), ROW_ALIGN))
    if bt >= B:
        bt = B  # single full-extent block; any B is legal when block == array dim
    return bt


def track_agile_forward(now_state, rel_dis, params, *, batch_tile=1024):
    """now_state: (B, 3), rel_dis: (B, 3) float32. Returns (B, 3) float32."""
    w1, b1, w2, b2, w3, b3 = params            # torch (out, in) layout
    B = now_state.shape[0]

    # Tiny weight repack (hundreds of bytes, negligible): per-layer packed blocks
    # in (in, out) orientation with the bias as the last row.
    p1 = jnp.concatenate([w1[:, :3].T, w1[:, 3:].T, b1[None, :]], axis=0)  # (7, 32)
    p2 = jnp.concatenate([w2.T, b2[None, :]], axis=0)                      # (33, 32)
    p3 = jnp.concatenate([w3.T, b3[None, :]], axis=0)                      # (33, 3)

    bt = _choose_batch_tile(B, batch_tile)
    grid = (pl.cdiv(B, bt),)

    out = pl.pallas_call(
        _mlp_kernel,
        out_shape=jax.ShapeDtypeStruct((B, OUT_DIM), jnp.float32),
        grid_spec=pltpu.PrefetchScalarGridSpec(
            num_scalar_prefetch=0,
            grid=grid,
            in_specs=[
                pl.BlockSpec((bt, 3), lambda i: (i, 0)),             # now_state tile
                pl.BlockSpec((bt, 3), lambda i: (i, 0)),             # rel_dis tile
                pl.BlockSpec((7, HID1), lambda i: (0, 0)),           # layer-1 params
                pl.BlockSpec((HID1 + 1, HID2), lambda i: (0, 0)),    # layer-2 params
                pl.BlockSpec((HID2 + 1, OUT_DIM), lambda i: (0, 0)),  # layer-3 params
            ],
            out_specs=pl.BlockSpec((bt, OUT_DIM), lambda i: (i, 0)),
        ),
        compiler_params=pltpu.CompilerParams(
            dimension_semantics=("parallel",)),
    )(now_state, rel_dis, p1, p2, p3)

    return out


def init_params(key):
    """kaiming_normal_ (fan_in, gain=sqrt(2)) weights in torch (out, in) layout;
    default nn.Linear uniform bias init."""
    ks = jax.random.split(key, 6)

    def _layer(kw, kb, fan_in, fan_out):
        std = math.sqrt(2.0 / fan_in)
        w = jax.random.normal(kw, (fan_out, fan_in), jnp.float32) * std
        bound = 1.0 / math.sqrt(fan_in)
        b = jax.random.uniform(kb, (fan_out,), jnp.float32, -bound, bound)
        return w, b

    w1, b1 = _layer(ks[0], ks[1], IN_DIM, HID1)
    w2, b2 = _layer(ks[2], ks[3], HID1, HID2)
    w3, b3 = _layer(ks[4], ks[5], HID2, OUT_DIM)
    return w1, b1, w2, b2, w3, b3


def reference(now_state, rel_dis, w1, b1, w2, b2, w3, b3):
    x = jnp.concatenate([now_state, rel_dis], axis=1)       # (B, 6)
    h1 = jax.nn.elu(x @ w1.T + b1)
    h2 = jax.nn.elu(h1 @ w2.T + b2)
    y = h2 @ w3.T + b3
    return jax.nn.sigmoid(y) * 2.0 - 1.0


if __name__ == "__main__":
    key = jax.random.PRNGKey(0)
    kp, kd = jax.random.split(key)
    params = init_params(kp)

    # B=200: 2 grid steps with a masked partial trailing block.
    # B=24:  single full-extent (non-aligned) block.
    # B=1024: 4 aligned grid steps (both v7x TensorCores busy).
    for B in (200, 24, 1024):
        ks, kr = jax.random.split(jax.random.fold_in(kd, B))
        now_state = jax.random.normal(ks, (B, 3), jnp.float32)
        rel_dis = jax.random.normal(kr, (B, 3), jnp.float32)

        out = jax.block_until_ready(track_agile_forward(now_state, rel_dis, params))
        ref = reference(now_state, rel_dis, *params)

        assert out.shape == (B, OUT_DIM)
        assert jnp.allclose(out, ref, atol=1e-5, rtol=1e-5), f"mismatch vs reference (B={B})"

    print("KERNEL_OK")
</pallas_src>

<mosaic_0001>
module attributes {stable_mosaic.version = 11 : i64} {
  func.func @_mlp_kernel(%arg0: i32, %arg1: memref<128x3xf32, #tpu.memory_space<vmem>>, %arg2: memref<128x3xf32, #tpu.memory_space<vmem>>, %arg3: memref<7x32xf32, #tpu.memory_space<vmem>>, %arg4: memref<33x32xf32, #tpu.memory_space<vmem>>, %arg5: memref<33x3xf32, #tpu.memory_space<vmem>>, %arg6: memref<128x3xf32, #tpu.memory_space<vmem>>) attributes {dimension_semantics = [#tpu.dimension_semantics<parallel>], iteration_bounds = array<i64: 2>, scalar_prefetch = 0 : i64, scratch_operands = 0 : i64, tpu.core_type = #tpu.core_type<tc>, window_params = [{transform_indices = @transform_0, window_bounds = array<i64: 128, 3>}, {transform_indices = @transform_1, window_bounds = array<i64: 128, 3>}, {pipeline_mode = #tpu.pipeline_mode<synchronous>, transform_indices = @transform_2, window_bounds = array<i64: 7, 32>}, {pipeline_mode = #tpu.pipeline_mode<synchronous>, transform_indices = @transform_3, window_bounds = array<i64: 33, 32>}, {pipeline_mode = #tpu.pipeline_mode<synchronous>, transform_indices = @transform_4, window_bounds = array<i64: 33, 3>}, {transform_indices = @transform_5, window_bounds = array<i64: 128, 3>}]} {
    %c0 = arith.constant 0 : index
    %c0_0 = arith.constant 0 : index
    %0 = vector.load %arg1[%c0, %c0_0] : memref<128x3xf32, #tpu.memory_space<vmem>>, vector<128x3xf32>
    %c0_1 = arith.constant 0 : index
    %c0_2 = arith.constant 0 : index
    %1 = vector.load %arg2[%c0_1, %c0_2] : memref<128x3xf32, #tpu.memory_space<vmem>>, vector<128x3xf32>
    %c0_3 = arith.constant 0 : index
    %c0_4 = arith.constant 0 : index
    %2 = vector.load %arg3[%c0_3, %c0_4] : memref<7x32xf32, #tpu.memory_space<vmem>>, vector<3x32xf32>
    %c3 = arith.constant 3 : index
    %c0_5 = arith.constant 0 : index
    %3 = vector.load %arg3[%c3, %c0_5] : memref<7x32xf32, #tpu.memory_space<vmem>>, vector<3x32xf32>
    %c6 = arith.constant 6 : index
    %c0_6 = arith.constant 0 : index
    %4 = vector.load %arg3[%c6, %c0_6] : memref<7x32xf32, #tpu.memory_space<vmem>>, vector<1x32xf32>
    %cst = arith.constant dense<0.000000e+00> : vector<128x32xf32>
    %5 = tpu.matmul %0, %2, %cst {dimension_numbers = #tpu.dot_dimension_numbers<[1], [0], [0], [1], [0, 0, 1, 1], [], []>} : vector<128x3xf32>, vector<3x32xf32>, vector<128x32xf32> -> vector<128x32xf32>
    %cst_7 = arith.constant dense<0.000000e+00> : vector<128x32xf32>
    %6 = tpu.matmul %1, %3, %cst_7 {dimension_numbers = #tpu.dot_dimension_numbers<[1], [0], [0], [1], [0, 0, 1, 1], [], []>} : vector<128x3xf32>, vector<3x32xf32>, vector<128x32xf32> -> vector<128x32xf32>
    %7 = arith.addf %5, %6 : vector<128x32xf32>
    %8 = vector.broadcast %4 : vector<1x32xf32> to vector<128x32xf32>
    %9 = arith.addf %7, %8 : vector<128x32xf32>
    %cst_8 = arith.constant 0.000000e+00 : f32
    %10 = vector.broadcast %cst_8 : f32 to vector<128x32xf32>
    %11 = arith.cmpf ogt, %9, %10 : vector<128x32xf32>
    %cst_9 = arith.constant 0.000000e+00 : f32
    %12 = vector.broadcast %cst_9 : f32 to vector<128x32xf32>
    %13 = arith.minimumf %9, %12 : vector<128x32xf32>
    %14 = math.exp %13 : vector<128x32xf32>
    %cst_10 = arith.constant 1.000000e+00 : f32
    %15 = vector.broadcast %cst_10 : f32 to vector<128x32xf32>
    %16 = arith.subf %14, %15 : vector<128x32xf32>
    %17 = arith.select %11, %9, %16 : vector<128x32xi1>, vector<128x32xf32>
    %c0_11 = arith.constant 0 : index
    %c0_12 = arith.constant 0 : index
    %18 = vector.load %arg4[%c0_11, %c0_12] : memref<33x32xf32, #tpu.memory_space<vmem>>, vector<32x32xf32>
    %c32 = arith.constant 32 : index
    %c0_13 = arith.constant 0 : index
    %19 = vector.load %arg4[%c32, %c0_13] : memref<33x32xf32, #tpu.memory_space<vmem>>, vector<1x32xf32>
    %cst_14 = arith.constant dense<0.000000e+00> : vector<128x32xf32>
    %20 = tpu.matmul %17, %18, %cst_14 {dimension_numbers = #tpu.dot_dimension_numbers<[1], [0], [0], [1], [0, 0, 1, 1], [], []>} : vector<128x32xf32>, vector<32x32xf32>, vector<128x32xf32> -> vector<128x32xf32>
    %21 = vector.broadcast %19 : vector<1x32xf32> to vector<128x32xf32>
    %22 = arith.addf %20, %21 : vector<128x32xf32>
    %cst_15 = arith.constant 0.000000e+00 : f32
    %23 = vector.broadcast %cst_15 : f32 to vector<128x32xf32>
    %24 = arith.cmpf ogt, %22, %23 : vector<128x32xf32>
    %cst_16 = arith.constant 0.000000e+00 : f32
    %25 = vector.broadcast %cst_16 : f32 to vector<128x32xf32>
    %26 = arith.minimumf %22, %25 : vector<128x32xf32>
    %27 = math.exp %26 : vector<128x32xf32>
    %cst_17 = arith.constant 1.000000e+00 : f32
    %28 = vector.broadcast %cst_17 : f32 to vector<128x32xf32>
    %29 = arith.subf %27, %28 : vector<128x32xf32>
    %30 = arith.select %24, %22, %29 : vector<128x32xi1>, vector<128x32xf32>
    %c0_18 = arith.constant 0 : index
    %c0_19 = arith.constant 0 : index
    %31 = vector.load %arg5[%c0_18, %c0_19] : memref<33x3xf32, #tpu.memory_space<vmem>>, vector<32x3xf32>
    %c32_20 = arith.constant 32 : index
    %c0_21 = arith.constant 0 : index
    %32 = vector.load %arg5[%c32_20, %c0_21] : memref<33x3xf32, #tpu.memory_space<vmem>>, vector<1x3xf32>
    %cst_22 = arith.constant dense<0.000000e+00> : vector<128x3xf32>
    %33 = tpu.matmul %30, %31, %cst_22 {dimension_numbers = #tpu.dot_dimension_numbers<[1], [0], [0], [1], [0, 0, 1, 1], [], []>} : vector<128x32xf32>, vector<32x3xf32>, vector<128x3xf32> -> vector<128x3xf32>
    %34 = vector.broadcast %32 : vector<1x3xf32> to vector<128x3xf32>
    %35 = arith.addf %33, %34 : vector<128x3xf32>
    %cst_23 = arith.constant 5.000000e-01 : f32
    %36 = vector.broadcast %cst_23 : f32 to vector<128x3xf32>
    %37 = arith.mulf %36, %35 : vector<128x3xf32>
    %38 = math.tanh %37 : vector<128x3xf32>
    %c0_24 = arith.constant 0 : index
    %c0_25 = arith.constant 0 : index
    %39 = vector.load %arg6[%c0_24, %c0_25] : memref<128x3xf32, #tpu.memory_space<vmem>>, vector<128x3xf32>
    tpu.vector_store %arg6[%c0_24, %c0_25], %38 {strides = array<i32>} : memref<128x3xf32, #tpu.memory_space<vmem>>, vector<128x3xf32>,
    return
  }
  func.func @transform_0(%arg0: i32) -> (i32, i32) {
    %c0_i32 = arith.constant 0 : i32
    %c0_i32_0 = arith.constant 0 : i32
    return %arg0, %c0_i32 : i32, i32
  }
  func.func @transform_1(%arg0: i32) -> (i32, i32) {
    %c0_i32 = arith.constant 0 : i32
    %c0_i32_0 = arith.constant 0 : i32
    return %arg0, %c0_i32 : i32, i32
  }
  func.func @transform_2(%arg0: i32) -> (i32, i32) {
    %c0_i32 = arith.constant 0 : i32
    %c0_i32_0 = arith.constant 0 : i32
    %c0_i32_1 = arith.constant 0 : i32
    return %c0_i32, %c0_i32_0 : i32, i32
  }
  func.func @transform_3(%arg0: i32) -> (i32, i32) {
    %c0_i32 = arith.constant 0 : i32
    %c0_i32_0 = arith.constant 0 : i32
    %c0_i32_1 = arith.constant 0 : i32
    return %c0_i32, %c0_i32_0 : i32, i32
  }
  func.func @transform_4(%arg0: i32) -> (i32, i32) {
    %c0_i32 = arith.constant 0 : i32
    %c0_i32_0 = arith.constant 0 : i32
    %c0_i32_1 = arith.constant 0 : i32
    return %c0_i32, %c0_i32_0 : i32, i32
  }
  func.func @transform_5(%arg0: i32) -> (i32, i32) {
    %c0_i32 = arith.constant 0 : i32
    %c0_i32_0 = arith.constant 0 : i32
    return %arg0, %c0_i32 : i32, i32
  }
}

</mosaic_0001>

<bundles_post_ra>
// kernel: tpu_custom_call.1
= control target key start
LH: loop header
LB: loop body
LE: loop exit
PB: predicated region body
PF: predicated region fallthrough
CT: control target
= control target key end

     0   :  { %s2323_s18 = smov 0   ;;  %s2325_s19 = smov 0   ;;  %s2841_s0 = inlined_call_operand.vmem [shape: f32[200,3], index: 0, kind: input, shape index: {}]   ;;  %s2842_s1 = inlined_call_operand.vmem [shape: f32[200,3], index: 1, kind: input, shape index: {}]   ;;  %s2843_s2 = inlined_call_operand.vmem [shape: f32[7,32], index: 2, kind: input, shape index: {}]   ;;  %s2844_s3 = inlined_call_operand.vmem [shape: f32[33,32], index: 3, kind: input, shape index: {}]   ;;  %s2845_s4 = inlined_call_operand.vmem [shape: f32[33,3], index: 4, kind: input, shape index: {}]   ;;  %s2846_s5 = inlined_call_operand.vmem [shape: f32[200,3], index: 5, kind: output, shape index: {}]  }
   0x1   :  { %s2327_s20 = smov 0  }
   0x2 LB: > { %s2336_s21 = sadd.s32 4294967295, %s2259_s20   ;;  %s2338_s22 = sadd.s32 1, %s2259_s20   ;;  %s2259_s20 = sphi %s2327_s20, %s2853_s20   ;;  %s2255_s19 = sphi %s2325_s19, %s2852_s19   ;;  %s2251_s18 = sphi %s2323_s18, %s2851_s18  }
   0x3   : > { %s134_s23 = ssub.s32 %s2259_s20, %s2338_s22  ;;  %s137_s24 = sadd.s32 1, %s2255_s19 }
   0x4   : > { %p135_p0 = scmp.eq.s32.totalorder %s134_s23, 0  ;;  %p147_p1 = scmp.ne.s32.totalorder %s2255_s19, %s2251_s18 }
   0x5   : > { %p148_p2 = scmp.eq.s32.totalorder %s2336_s21, 1  ;;  %p1672_p3 = scmp.ge.s32.totalorder %s2259_s20, 1 }
   0x6   : > { %s2346_s25 = scalar_select %p135_p0, %s2255_s19, %s137_s24  }
   0x7   : > { %p2348_p4 = por %p148_p2, %p147_p1  ;;  %p215_p5 = scmp.lt.s32.totalorder %s2259_s20, 3 }
   0x9   : > { %p216_p6 = pnand %p1672_p3, %p215_p5 }
   0xa   : > { %v321_v0 = vld [vmem:[%s2843_s2 + $0x3] sm:$0x7] (!%p216_p6)  ;;  %vm372_vm0 = vcmask (!%p216_p6), 1042432   ;;  %s2356_s29 = sshll.u32 (!%p216_p6), %s2336_s21, 4  ;;  %v320_v1 = vld [vmem:[%s2843_s2] sm:$0x7] (!%p216_p6) }
   0xb   : > { %219 = sbr.rel (%p216_p6) target bundleno = 830 (0x33e), region = 40  ;;  %1873 = vmatprep.subr.msk.mxu0 (!%p216_p6), %vm372_vm0, %v321_v0  ;;  %p260_p7 = scmp.lt.s32.totalorder (!%p216_p6), %s2356_s29, 24  ;;  %vm323_vm1 = vcmask (!%p216_p6), 23552   ;;  %v833_v34 = vld [vmem:[%s2844_s3] sm:$0xff] (!%p216_p6)  ;;  %v834_v35 = vld [vmem:[%s2844_s3 + $0x8] sm:$0xff] (!%p216_p6)  ;;  %v835_v37 = vld [vmem:[%s2844_s3 + $0x10] sm:$0xff] (!%p216_p6) }
   0xc   : > { %1874 = vmatpush3.msk.msra.mxu0 (!%p216_p6), %vm372_vm0, %v321_v0  ;;  %v1989_v36 = vpack.c.bf16 (!%p216_p6), %v834_v35, %v833_v34  ;;  %v836_v38 = vld [vmem:[%s2844_s3 + $0x18] sm:$0xff] (!%p216_p6)  ;;  %v1132_v40 = vld [vmem:[%s2845_s4] sm:$0xff] (!%p216_p6)  ;;  %v1133_v41 = vld [vmem:[%s2845_s4 + $0x8] sm:$0xff] (!%p216_p6)  ;;  %vm842_vm2 = vcmask (!%p216_p6), 261120   ;;  %s252_s23 = sand.u32 (!%p216_p6), 1, %s2251_s18  }
   0xd   : > { %1899 = vmatprep.subr.msk.mxu0 (!%p216_p6), %vm372_vm0, %v320_v1  ;;  %v1993_v39 = vpack.c.bf16 (!%p216_p6), %v836_v38, %v835_v37  ;;  %v2466_v42 = vpack.c.bf16 (!%p216_p6), %v1133_v41, %v1132_v40  ;;  %v2472_v43 = vld [vmem:[%s2843_s2 + $0x6] ss:$0 sm:$0xff] (!%p216_p6)  ;;  %s1673_s24 = sshll.u32 (!%p216_p6), %s252_s23, 7 }
   0xe   : > { %1990 = vmatprep.subr.bf16.mxu1 (!%p216_p6), %v1989_v36  ;;  %s2699_s18 = scalar_lea.vmem (!%p216_p6), [#allocation2], %s1673_s24  }
   0xf   : > { %1992 = vmatpush3.bf16.msra.mxu1 (!%p216_p6), %v1989_v36 }
  0x10   : > { %1994 = vmatprep.subr.bf16.mxu1 (!%p216_p6), %v1993_v39 }
  0x12   : > { %s2365_s7 = scalar_select %p260_p7, %s2356_s29, 24 }
  0x13   : > { %1996 = vmatpush3.bf16.msra.mxu1 %v1993_v39  ;;  %s1390_s27 = ssub.s32 (%p2348_p4), 25, %s2356_s29  ;;  %s1796_s28 = sshll.u32 (%p2348_p4), %s2336_s21, 7 }
  0x14   : > { %s1675_s8 = sshll.u32 %s2365_s7, 3  ;;  %1998 = vmatprep.subr.bf16.mxu1 %v2466_v42  ;;  %p1391_p8 = scmp.lt.s32.totalorder (%p2348_p4), %s1390_s27, 16 }
  0x15   : > { %s2374_s11 = scalar_lea.vmem %s2842_s1, %s1675_s8  ;;  %s2410_s14 = scalar_lea.vmem %s2841_s0, %s1675_s8 }
  0x16   : > { %v304_v2 = vld [vmem:[%s2374_s11] sm:$0xff]  ;;  %v305_v3 = vld [vmem:[%s2374_s11 + $0x8] sm:$0xff]  ;;  %v306_v4 = vld [vmem:[%s2374_s11 + $0x10] sm:$0xff]  ;;  %s2748_s7 = scalar_lea.vmem (%p2348_p4), %s2846_s5, %s1796_s28  }
  0x17   : > { %1875 = vmatprep.mubr.msk.f32.mxu0 %vm323_vm1, %v304_v2  ;;  %v307_v5 = vld [vmem:[%s2374_s11 + $0x18] sm:$0xff]  ;;  %v308_v6 = vld [vmem:[%s2374_s11 + $0x20] sm:$0xff]  ;;  %v309_v7 = vld [vmem:[%s2374_s11 + $0x28] sm:$0xff] }
  0x18   : > { %1876 = vmatmul.mubr.msk.f32.vlgmr.msra.gmra.mrb[0].mxu0 %vm323_vm1, %v305_v3  ;;  %v310_v8 = vld [vmem:[%s2374_s11 + $0x30] sm:$0xff]  ;;  %v311_v9 = vld [vmem:[%s2374_s11 + $0x38] sm:$0xff]  ;;  %v312_v10 = vld [vmem:[%s2374_s11 + $0x40] sm:$0xff] }
  0x19   : > { %1900 = vmatpush3.msk.msra.mxu0 %vm372_vm0, %v320_v1  ;;  %1878 = vmatprep.mubr.msk.f32.mxu0 %vm323_vm1, %v306_v4  ;;  %v313_v11 = vld [vmem:[%s2374_s11 + $0x48] sm:$0xff]  ;;  %v314_v12 = vld [vmem:[%s2374_s11 + $0x50] sm:$0xff]  ;;  %v315_v13 = vld [vmem:[%s2374_s11 + $0x58] sm:$0xff] }
  0x1a   : > { %v316_v14 = vld [vmem:[%s2374_s11 + $0x60] sm:$0xff]  ;;  %v317_v15 = vld [vmem:[%s2374_s11 + $0x68] sm:$0xff]  ;;  %v318_v16 = vld [vmem:[%s2374_s11 + $0x70] sm:$0xff] }
  0x1b   : > { %v319_v17 = vld [vmem:[%s2374_s11 + $0x78] sm:$0xff]  ;;  %v288_v18 = vld [vmem:[%s2410_s14] sm:$0xff]  ;;  %v289_v19 = vld [vmem:[%s2410_s14 + $0x8] sm:$0xff] }
  0x1c   : > { %1879 = vmatmul.mubr.msk.f32.gmra.mrb[2].mxu0 %vm323_vm1, %v307_v5  ;;  %v290_v20 = vld [vmem:[%s2410_s14 + $0x10] sm:$0xff]  ;;  %v291_v21 = vld [vmem:[%s2410_s14 + $0x18] sm:$0xff]  ;;  %v292_v22 = vld [vmem:[%s2410_s14 + $0x20] sm:$0xff] }
  0x1d   : > { %1881 = vmatprep.mubr.msk.f32.mxu0 %vm323_vm1, %v308_v6  ;;  %v293_v23 = vld [vmem:[%s2410_s14 + $0x28] sm:$0xff]  ;;  %v294_v24 = vld [vmem:[%s2410_s14 + $0x30] sm:$0xff]  ;;  %v295_v25 = vld [vmem:[%s2410_s14 + $0x38] sm:$0xff] }
  0x1e   : > { %v296_v26 = vld [vmem:[%s2410_s14 + $0x40] sm:$0xff]  ;;  %v297_v27 = vld [vmem:[%s2410_s14 + $0x48] sm:$0xff]  ;;  %v298_v28 = vld [vmem:[%s2410_s14 + $0x50] sm:$0xff] }
  0x1f   : > { %v299_v29 = vld [vmem:[%s2410_s14 + $0x58] sm:$0xff]  ;;  %v300_v30 = vld [vmem:[%s2410_s14 + $0x60] sm:$0xff]  ;;  %v301_v31 = vld [vmem:[%s2410_s14 + $0x68] sm:$0xff] }
  0x20   : > { %1882 = vmatmul.mubr.msk.f32.gmra.mrb[4].mxu0 %vm323_vm1, %v309_v7  ;;  %v302_v32 = vld [vmem:[%s2410_s14 + $0x70] sm:$0xff]  ;;  %v303_v33 = vld [vmem:[%s2410_s14 + $0x78] sm:$0xff] }
  0x21   : > { %1884 = vmatprep.mubr.msk.f32.mxu0 %vm323_vm1, %v310_v8 }
  0x24   : > { %1885 = vmatmul.mubr.msk.f32.gmra.mrb[6].mxu0 %vm323_vm1, %v311_v9 }
  0x25   : > { %1887 = vmatprep.mubr.msk.f32.mxu0 %vm323_vm1, %v312_v10 }
  0x28   : > { %1888 = vmatmul.mubr.msk.f32.gmra.mrb[8].mxu0 %vm323_vm1, %v313_v11 }
  0x29   : > { %1890 = vmatprep.mubr.msk.f32.mxu0 %vm323_vm1, %v314_v12 }
  0x2c   : > { %1891 = vmatmul.mubr.msk.f32.gmra.mrb[10].mxu0 %vm323_vm1, %v315_v13 }
  0x2d   : > { %1893 = vmatprep.mubr.msk.f32.mxu0 %vm323_vm1, %v316_v14 }
  0x30   : > { %1894 = vmatmul.mubr.msk.f32.gmra.mrb[12].mxu0 %vm323_vm1, %v317_v15 }
  0x31   : > { %1896 = vmatprep.mubr.msk.f32.mxu0 %vm323_vm1, %v318_v16 }
  0x34   : > { %1897 = vmatmul.mubr.msk.f32.gmra.mrb[14].mxu0 %vm323_vm1, %v319_v17 }
  0x35   : > { %1901 = vmatprep.mubr.msk.f32.mxu0 %vm323_vm1, %v288_v18 }
  0x38   : > { %1902 = vmatmul.mubr.msk.f32.vlgmr.msra.gmra.mrb[0].mxu0 %vm323_vm1, %v289_v19 }
  0x39   : > { %1904 = vmatprep.mubr.msk.f32.mxu0 %vm323_vm1, %v290_v20 }
  0x3c   : > { %1905 = vmatmul.mubr.msk.f32.gmra.mrb[2].mxu0 %vm323_vm1, %v291_v21 }
  0x3d   : > { %1907 = vmatprep.mubr.msk.f32.mxu0 %vm323_vm1, %v292_v22 }
  0x40   : > { %1908 = vmatmul.mubr.msk.f32.gmra.mrb[4].mxu0 %vm323_vm1, %v293_v23 }
  0x41   : > { %1910 = vmatprep.mubr.msk.f32.mxu0 %vm323_vm1, %v294_v24 }
  0x44   : > { %1911 = vmatmul.mubr.msk.f32.gmra.mrb[6].mxu0 %vm323_vm1, %v295_v25 }
  0x45   : > { %1913 = vmatprep.mubr.msk.f32.mxu0 %vm323_vm1, %v296_v26 }
  0x48   : > { %1914 = vmatmul.mubr.msk.f32.gmra.mrb[8].mxu0 %vm323_vm1, %v297_v27 }
  0x49   : > { %1916 = vmatprep.mubr.msk.f32.mxu0 %vm323_vm1, %v298_v28 }
  0x4c   : > { %1917 = vmatmul.mubr.msk.f32.gmra.mrb[10].mxu0 %vm323_vm1, %v299_v29 }
  0x4d   : > { %1919 = vmatprep.mubr.msk.f32.mxu0 %vm323_vm1, %v300_v30 }
  0x50   : > { %1920 = vmatmul.mubr.msk.f32.gmra.mrb[12].mxu0 %vm323_vm1, %v301_v31 }
  0x51   : > { %1922 = vmatprep.mubr.msk.f32.mxu0 %vm323_vm1, %v302_v32 }
  0x54   : > { %1923 = vmatmul.mubr.msk.f32.gmra.mrb[14].mxu0 %vm323_vm1, %v303_v33 }
 0x10b   : > { %v1903_v44 = vpop.f32.mrb[0].mxu0 }
 0x10c   : > { %v2475_v45 = vadd.f32 %v1903_v44, %v2472_v43  ;;  %v638_v46 = vpop.f32.mrb[1].mxu0 }
 0x10d   : > { %v721_v47 = vadd.f32 %v2472_v43, %v638_v46 }
 0x10e   : > { %v754_v48 = vmin.f32 %v2475_v45, 0.0  ;;  %vm738_vm4 = vcmp.gt.f32.partialorder %v2475_v45, 0.0 }
 0x10f   : > { %v753_v49 = vmin.f32 %v721_v47, 0.0  ;;  %v1906_v50 = vpop.f32.mrb[2].mxu0  ;;  %vm737_vm3 = vcmp.gt.f32.partialorder %v721_v47, 0.0 }
 0x110   : > { %v771_v51 = vmul.f32 1.442695, %v754_v48  ;;  %v2480_v52 = vadd.f32 %v1906_v50, %v2472_v43  ;;  %v648_v53 = vpop.f32.mrb[3].mxu0 }
 0x111   : > { %v769_v54 = vmul.f32 1.442695, %v753_v49  ;;  %v2483_v55 = vadd.f32 %v2472_v43, %v648_v53 }
 0x112   : > { %2109 = vpow2.f32 %v771_v51  ;;  %v756_v56 = vmin.f32 %v2480_v52, 0.0  ;;  %vm740_vm6 = vcmp.gt.f32.partialorder %v2480_v52, 0.0 }
 0x113   : > { %2111 = vpow2.f32 %v769_v54  ;;  %v755_v57 = vmin.f32 %v2483_v55, 0.0  ;;  %v1909_v58 = vpop.f32.mrb[4].mxu0  ;;  %vm739_vm5 = vcmp.gt.f32.partialorder %v2483_v55, 0.0 }
 0x114   : > { %v775_v59 = vmul.f32 1.442695, %v756_v56  ;;  %v2488_v60 = vadd.f32 %v1909_v58, %v2472_v43  ;;  %v658_v61 = vpop.f32.mrb[5].mxu0 }
 0x115   : > { %v773_v62 = vmul.f32 1.442695, %v755_v57  ;;  %v2491_v63 = vadd.f32 %v2472_v43, %v658_v61 }
 0x116   : > { %2113 = vpow2.f32 %v775_v59  ;;  %v758_v0 = vmin.f32 %v2488_v60, 0.0  ;;  %vm742_vm8 = vcmp.gt.f32.partialorder %v2488_v60, 0.0 }
 0x117   : > { %2115 = vpow2.f32 %v773_v62  ;;  %v757_v1 = vmin.f32 %v2491_v63, 0.0  ;;  %v1912_v2 = vpop.f32.mrb[6].mxu0  ;;  %vm741_vm7 = vcmp.gt.f32.partialorder %v2491_v63, 0.0 }
 0x118   : > { %v779_v3 = vmul.f32 1.442695, %v758_v0  ;;  %v2496_v4 = vadd.f32 %v1912_v2, %v2472_v43  ;;  %v668_v5 = vpop.f32.mrb[7].mxu0 }
 0x119   : > { %v777_v6 = vmul.f32 1.442695, %v757_v1  ;;  %v2499_v7 = vadd.f32 %v2472_v43, %v668_v5 }
 0x11a   : > { %2117 = vpow2.f32 %v779_v3  ;;  %v760_v8 = vmin.f32 %v2496_v4, 0.0  ;;  %vm744_vm10 = vcmp.gt.f32.partialorder %v2496_v4, 0.0 }
 0x11b   : > { %2119 = vpow2.f32 %v777_v6  ;;  %v759_v9 = vmin.f32 %v2499_v7, 0.0  ;;  %v1915_v10 = vpop.f32.mrb[8].mxu0  ;;  %vm743_vm9 = vcmp.gt.f32.partialorder %v2499_v7, 0.0 }
 0x11c   : > { %v2110_v11 = vpop.eup %2109  ;;  %v783_v12 = vmul.f32 1.442695, %v760_v8  ;;  %v2504_v13 = vadd.f32 %v1915_v10, %v2472_v43  ;;  %v678_v14 = vpop.f32.mrb[9].mxu0 }
 0x11d   : > { %v2112_v15 = vpop.eup %2111  ;;  %v781_v16 = vmul.f32 1.442695, %v759_v9  ;;  %v2507_v17 = vadd.f32 %v2472_v43, %v678_v14  ;;  %v1714_v18 = vadd.f32 -1.0, %v2110_v11 }
 0x11e   : > { %2121 = vpow2.f32 %v783_v12  ;;  %v762_v19 = vmin.f32 %v2504_v13, 0.0  ;;  %v1713_v20 = vadd.f32 -1.0, %v2112_v15  ;;  %vm746_vm12 = vcmp.gt.f32.partialorder %v2504_v13, 0.0 }
 0x11f   : > { %2123 = vpow2.f32 %v781_v16  ;;  %v761_v21 = vmin.f32 %v2507_v17, 0.0  ;;  %v1918_v22 = vpop.f32.mrb[10].mxu0  ;;  %v818_v31 = vsel %vm738_vm4, %v2475_v45, %v1714_v18  ;;  %vm745_vm11 = vcmp.gt.f32.partialorder %v2507_v17, 0.0 }
 0x120   : > { %v2114_v23 = vpop.eup %2113  ;;  %v787_v24 = vmul.f32 1.442695, %v762_v19  ;;  %v2513_v25 = vadd.f32 %v1918_v22, %v2472_v43  ;;  %v688_v26 = vpop.f32.mrb[11].mxu0  ;;  %v817_v27 = vsel %vm737_vm3, %v721_v47, %v1713_v20 }
 0x121   : > { %v2116_v28 = vpop.eup %2115  ;;  %v785_v29 = vmul.f32 1.442695, %v761_v21  ;;  %v2516_v30 = vadd.f32 %v2472_v43, %v688_v26  ;;  %1933 = vmatprep.mubr.msk.f32.mxu1 %vm842_vm2, %v817_v27  ;;  %v1716_v32 = vadd.f32 -1.0, %v2114_v23 }
 0x122   : > { %2125 = vpow2.f32 %v787_v24  ;;  %v764_v33 = vmin.f32 %v2513_v25, 0.0  ;;  %1934 = vmatmul.mubr.msk.f32.vlgmr.msra.gmra.mrb[0].mxu1 %vm842_vm2, %v818_v31  ;;  %v1715_v34 = vadd.f32 -1.0, %v2116_v28  ;;  %vm748_vm14 = vcmp.gt.f32.partialorder %v2513_v25, 0.0  ;;  %v1134_v28 = vld [vmem:[%s2845_s4 + $0x10] sm:$0xff]  ;;  %v2586_v31 = vld [vmem:[%s2844_s3 + $0x20] ss:$0 sm:$0xff] }
 0x123   : > { %2127 = vpow2.f32 %v785_v29  ;;  %v763_v35 = vmin.f32 %v2516_v30, 0.0  ;;  %v1921_v36 = vpop.f32.mrb[12].mxu0  ;;  %2000 = vmatpush3.bf16.msra.mxu1 %v2466_v42  ;;  %v820_v47 = vsel %vm740_vm6, %v2480_v52, %v1716_v32  ;;  %vm747_vm13 = vcmp.gt.f32.partialorder %v2516_v30, 0.0  ;;  %v1135_v29 = vld [vmem:[%s2845_s4 + $0x18] sm:$0xff] }
 0x124   : > { %v2118_v37 = vpop.eup %2117  ;;  %v791_v38 = vmul.f32 1.442695, %v764_v33  ;;  %v2527_v39 = vadd.f32 %v1921_v36, %v2472_v43  ;;  %v698_v40 = vpop.f32.mrb[13].mxu0  ;;  %v819_v41 = vsel %vm739_vm5, %v2483_v55, %v1715_v34 }
 0x125   : > { %v2120_v44 = vpop.eup %2119  ;;  %v789_v45 = vmul.f32 1.442695, %v763_v35  ;;  %v2531_v46 = vadd.f32 %v2472_v43, %v698_v40  ;;  %1936 = vmatprep.mubr.msk.f32.mxu1 %vm842_vm2, %v819_v41  ;;  %v1718_v42 = vadd.f32 -1.0, %v2118_v37 }
 0x126   : > { %2129 = vpow2.f32 %v791_v38  ;;  %v766_v48 = vmin.f32 %v2527_v39, 0.0  ;;  %1937 = vmatmul.mubr.msk.f32.gmra.mrb[2].mxu1 %vm842_vm2, %v820_v47  ;;  %v1717_v49 = vadd.f32 -1.0, %v2120_v44  ;;  %vm750_vm0 = vcmp.gt.f32.partialorder %v2527_v39, 0.0 }
 0x127   : > { %2131 = vpow2.f32 %v789_v45  ;;  %v765_v50 = vmin.f32 %v2531_v46, 0.0  ;;  %v1924_v51 = vpop.f32.mrb[14].mxu0  ;;  %v822_v61 = vsel %vm742_vm8, %v2488_v60, %v1718_v42  ;;  %vm749_vm15 = vcmp.gt.f32.partialorder %v2531_v46, 0.0 }
 0x128   : > { %v2122_v53 = vpop.eup %2121  ;;  %v795_v54 = vmul.f32 1.442695, %v766_v48  ;;  %v2541_v55 = vadd.f32 %v1924_v51, %v2472_v43  ;;  %v708_v52 = vpop.f32.mrb[15].mxu0  ;;  %v821_v56 = vsel %vm741_vm7, %v2491_v63, %v1717_v49 }
 0x129   : > { %v2124_v57 = vpop.eup %2123  ;;  %v793_v58 = vmul.f32 1.442695, %v765_v50  ;;  %v735_v59 = vadd.f32 %v2472_v43, %v708_v52  ;;  %1939 = vmatprep.mubr.msk.f32.mxu1 %vm842_vm2, %v821_v56  ;;  %v1720_v62 = vadd.f32 -1.0, %v2122_v53 }
 0x12a   : > { %2133 = vpow2.f32 %v795_v54  ;;  %v768_v0 = vmin.f32 %v2541_v55, 0.0  ;;  %1940 = vmatmul.mubr.msk.f32.gmra.mrb[4].mxu1 %vm842_vm2, %v822_v61  ;;  %v1719_v1 = vadd.f32 -1.0, %v2124_v57  ;;  %vm752_vm4 = vcmp.gt.f32.partialorder %v2541_v55, 0.0 }
 0x12b   : > { %2135 = vpow2.f32 %v793_v58  ;;  %v767_v2 = vmin.f32 %v735_v59, 0.0  ;;  %v824_v60 = vsel %vm744_vm10, %v2496_v4, %v1720_v62  ;;  %vm751_vm3 = vcmp.gt.f32.partialorder %v735_v59, 0.0 }
 0x12c   : > { %v2126_v63 = vpop.eup %2125  ;;  %v799_v3 = vmul.f32 1.442695, %v768_v0  ;;  %v823_v43 = vsel %vm743_vm9, %v2499_v7, %v1719_v1 }
 0x12d   : > { %v2128_v5 = vpop.eup %2127  ;;  %v797_v6 = vmul.f32 1.442695, %v767_v2  ;;  %1942 = vmatprep.mubr.msk.f32.mxu1 %vm842_vm2, %v823_v43  ;;  %v1722_v8 = vadd.f32 -1.0, %v2126_v63 }
 0x12e   : > { %2137 = vpow2.f32 %v799_v3  ;;  %1943 = vmatmul.mubr.msk.f32.gmra.mrb[6].mxu1 %vm842_vm2, %v824_v60  ;;  %v1721_v9 = vadd.f32 -1.0, %v2128_v5 }
 0x12f   : > { %2139 = vpow2.f32 %v797_v6  ;;  %v826_v12 = vsel %vm746_vm12, %v2504_v13, %v1722_v8 }
 0x130   : > { %v2130_v10 = vpop.eup %2129  ;;  %v825_v11 = vsel %vm745_vm11, %v2507_v17, %v1721_v9 }
 0x131   : > { %v2132_v7 = vpop.eup %2131  ;;  %1945 = vmatprep.mubr.msk.f32.mxu1 %vm842_vm2, %v825_v11  ;;  %v1724_v14 = vadd.f32 -1.0, %v2130_v10 }
 0x132   : > { %1946 = vmatmul.mubr.msk.f32.gmra.mrb[8].mxu1 %vm842_vm2, %v826_v12  ;;  %v1723_v4 = vadd.f32 -1.0, %v2132_v7 }
 0x133   : > { %v828_v17 = vsel %vm748_vm14, %v2513_v25, %v1724_v14 }
 0x134   : > { %v2134_v15 = vpop.eup %2133  ;;  %v827_v16 = vsel %vm747_vm13, %v2516_v30, %v1723_v4  ;;  %v2001_v30 = vpack.c.bf16 %v1135_v29, %v1134_v28 }
 0x135   : > { %v2136_v18 = vpop.eup %2135  ;;  %1948 = vmatprep.mubr.msk.f32.mxu1 %vm842_vm2, %v827_v16  ;;  %v1726_v19 = vadd.f32 -1.0, %v2134_v15 }
 0x136   : > { %1949 = vmatmul.mubr.msk.f32.gmra.mrb[10].mxu1 %vm842_vm2, %v828_v17  ;;  %v1725_v13 = vadd.f32 -1.0, %v2136_v18  ;;  %2002 = vmatprep.subr.bf16.mxu1 %v2001_v30 }
 0x137   : > { %v830_v23 = vsel %vm750_vm0, %v2527_v39, %v1726_v19  ;;  %2004 = vmatpush3.bf16.msra.mxu1 %v2001_v30 }
 0x138   : > { %v2138_v20 = vpop.eup %2137  ;;  %v829_v21 = vsel %vm749_vm15, %v2531_v46, %v1725_v13 }
 0x139   : > { %v2140_v22 = vpop.eup %2139  ;;  %1951 = vmatprep.mubr.msk.f32.mxu1 %vm842_vm2, %v829_v21  ;;  %v1728_v24 = vadd.f32 -1.0, %v2138_v20 }
 0x13a   : > { %1952 = vmatmul.mubr.msk.f32.gmra.mrb[12].mxu1 %vm842_vm2, %v830_v23  ;;  %v1727_v25 = vadd.f32 -1.0, %v2140_v22 }
 0x13b   : > { %v832_v27 = vsel %vm752_vm4, %v2541_v55, %v1728_v24 }
 0x13c   : > { %v831_v26 = vsel %vm751_vm3, %v735_v59, %v1727_v25 }
 0x13d   : > { %1954 = vmatprep.mubr.msk.f32.mxu1 %vm842_vm2, %v831_v26 }
 0x13e   : > { %1955 = vmatmul.mubr.msk.f32.gmra.mrb[14].mxu1 %vm842_vm2, %v832_v27 }
 0x1f5   : > { %v1935_v32 = vpop.f32.mrb[0].mxu1 }
 0x1f6   : > { %v963_v33 = vadd.f32 %v1935_v32, %v2586_v31  ;;  %v957_v34 = vpop.f32.mrb[1].mxu1 }
 0x1f7   : > { %v958_v35 = vadd.f32 %v2586_v31, %v957_v34 }
 0x1f8   : > { %v1053_v36 = vmin.f32 %v963_v33, 0.0  ;;  %vm1037_vm6 = vcmp.gt.f32.partialorder %v963_v33, 0.0 }
 0x1f9   : > { %v1052_v37 = vmin.f32 %v958_v35, 0.0  ;;  %v1938_v38 = vpop.f32.mrb[2].mxu1  ;;  %vm1036_vm5 = vcmp.gt.f32.partialorder %v958_v35, 0.0 }
 0x1fa   : > { %v1070_v39 = vmul.f32 1.442695, %v1053_v36  ;;  %v2591_v40 = vadd.f32 %v1938_v38, %v2586_v31  ;;  %v967_v41 = vpop.f32.mrb[3].mxu1 }
 0x1fb   : > { %v1068_v44 = vmul.f32 1.442695, %v1052_v37  ;;  %v2594_v45 = vadd.f32 %v2586_v31, %v967_v41 }
 0x1fc   : > { %2141 = vpow2.f32 %v1070_v39  ;;  %v1055_v46 = vmin.f32 %v2591_v40, 0.0  ;;  %vm1039_vm8 = vcmp.gt.f32.partialorder %v2591_v40, 0.0 }
 0x1fd   : > { %2143 = vpow2.f32 %v1068_v44  ;;  %v1054_v47 = vmin.f32 %v2594_v45, 0.0  ;;  %v1941_v42 = vpop.f32.mrb[4].mxu1  ;;  %vm1038_vm7 = vcmp.gt.f32.partialorder %v2594_v45, 0.0 }
 0x1fe   : > { %v1074_v48 = vmul.f32 1.442695, %v1055_v46  ;;  %v2599_v49 = vadd.f32 %v1941_v42, %v2586_v31  ;;  %v977_v50 = vpop.f32.mrb[5].mxu1 }
 0x1ff   : > { %v1072_v51 = vmul.f32 1.442695, %v1054_v47  ;;  %v2602_v53 = vadd.f32 %v2586_v31, %v977_v50 }
 0x200   : > { %2145 = vpow2.f32 %v1074_v48  ;;  %v1057_v54 = vmin.f32 %v2599_v49, 0.0  ;;  %vm1041_vm10 = vcmp.gt.f32.partialorder %v2599_v49, 0.0 }
 0x201   : > { %2147 = vpow2.f32 %v1072_v51  ;;  %v1056_v55 = vmin.f32 %v2602_v53, 0.0  ;;  %v1944_v52 = vpop.f32.mrb[6].mxu1  ;;  %vm1040_vm9 = vcmp.gt.f32.partialorder %v2602_v53, 0.0 }
 0x202   : > { %v1078_v56 = vmul.f32 1.442695, %v1057_v54  ;;  %v2607_v57 = vadd.f32 %v1944_v52, %v2586_v31  ;;  %v987_v58 = vpop.f32.mrb[7].mxu1 }
 0x203   : > { %v1076_v59 = vmul.f32 1.442695, %v1056_v55  ;;  %v2610_v61 = vadd.f32 %v2586_v31, %v987_v58 }
 0x204   : > { %2149 = vpow2.f32 %v1078_v56  ;;  %v1059_v62 = vmin.f32 %v2607_v57, 0.0  ;;  %vm1043_vm12 = vcmp.gt.f32.partialorder %v2607_v57, 0.0 }
 0x205   : > { %2151 = vpow2.f32 %v1076_v59  ;;  %v1058_v0 = vmin.f32 %v2610_v61, 0.0  ;;  %v1947_v1 = vpop.f32.mrb[8].mxu1  ;;  %vm1042_vm11 = vcmp.gt.f32.partialorder %v2610_v61, 0.0 }
 0x206   : > { %v2142_v2 = vpop.eup %2141  ;;  %v1082_v63 = vmul.f32 1.442695, %v1059_v62  ;;  %v2615_v3 = vadd.f32 %v1947_v1, %v2586_v31  ;;  %v997_v43 = vpop.f32.mrb[9].mxu1 }
 0x207   : > { %v2144_v5 = vpop.eup %2143  ;;  %v1747_v6 = vadd.f32 -1.0, %v2142_v2  ;;  %v1080_v60 = vmul.f32 1.442695, %v1058_v0  ;;  %v2618_v8 = vadd.f32 %v2586_v31, %v997_v43 }
 0x208   : > { %2153 = vpow2.f32 %v1082_v63  ;;  %v1061_v9 = vmin.f32 %v2615_v3, 0.0  ;;  %v1746_v10 = vadd.f32 -1.0, %v2144_v5  ;;  %vm1045_vm14 = vcmp.gt.f32.partialorder %v2615_v3, 0.0 }
 0x209   : > { %2155 = vpow2.f32 %v1080_v60  ;;  %v1060_v11 = vmin.f32 %v2618_v8, 0.0  ;;  %v1950_v7 = vpop.f32.mrb[10].mxu1  ;;  %v1117_v17 = vsel %vm1037_vm6, %v963_v33, %v1747_v6  ;;  %vm1044_vm13 = vcmp.gt.f32.partialorder %v2618_v8, 0.0 }
 0x20a   : > { %v2146_v12 = vpop.eup %2145  ;;  %v1086_v14 = vmul.f32 1.442695, %v1061_v9  ;;  %v2623_v4 = vadd.f32 %v1950_v7, %v2586_v31  ;;  %v1007_v15 = vpop.f32.mrb[11].mxu1  ;;  %v1116_v16 = vsel %vm1036_vm5, %v958_v35, %v1746_v10 }
 0x20b   : > { %v2148_v18 = vpop.eup %2147  ;;  %v1084_v19 = vmul.f32 1.442695, %v1060_v11  ;;  %v2626_v13 = vadd.f32 %v2586_v31, %v1007_v15  ;;  %1965 = vmatprep.mubr.msk.f32.mxu1 %vm842_vm2, %v1116_v16  ;;  %v1749_v20 = vadd.f32 -1.0, %v2146_v12 }
 0x20c   : > { %2157 = vpow2.f32 %v1086_v14  ;;  %v1063_v21 = vmin.f32 %v2623_v4, 0.0  ;;  %1966 = vmatmul.mubr.msk.f32.vlgmr.msra.gmra.mrb[16].mxu1 %vm842_vm2, %v1117_v17  ;;  %v1748_v22 = vadd.f32 -1.0, %v2148_v18  ;;  %vm1047_vm0 = vcmp.gt.f32.partialorder %v2623_v4, 0.0  ;;  %v2688_v18 = vld [vmem:[%s2845_s4 + $0x20] ss:$0 sm:$0xff] }
 0x20d   : > { %2159 = vpow2.f32 %v1084_v19  ;;  %v1062_v23 = vmin.f32 %v2626_v13, 0.0  ;;  %v1953_v24 = vpop.f32.mrb[12].mxu1  ;;  %v1119_v34 = vsel %vm1039_vm8, %v2591_v40, %v1749_v20  ;;  %vm1046_vm15 = vcmp.gt.f32.partialorder %v2626_v13, 0.0 }
 0x20e   : > { %v2150_v25 = vpop.eup %2149  ;;  %v1090_v26 = vmul.f32 1.442695, %v1063_v21  ;;  %v2635_v27 = vadd.f32 %v1953_v24, %v2586_v31  ;;  %v1017_v28 = vpop.f32.mrb[13].mxu1  ;;  %v1118_v29 = vsel %vm1038_vm7, %v2594_v45, %v1748_v22 }
 0x20f   : > { %v2152_v30 = vpop.eup %2151  ;;  %v1088_v32 = vmul.f32 1.442695, %v1062_v23  ;;  %v2639_v33 = vadd.f32 %v2586_v31, %v1017_v28  ;;  %1968 = vmatprep.mubr.msk.f32.mxu1 %vm842_vm2, %v1118_v29  ;;  %v1751_v35 = vadd.f32 -1.0, %v2150_v25 }
 0x210   : > { %2161 = vpow2.f32 %v1090_v26  ;;  %v1065_v36 = vmin.f32 %v2635_v27, 0.0  ;;  %1969 = vmatmul.mubr.msk.f32.gmra.mrb[18].mxu1 %vm842_vm2, %v1119_v34  ;;  %v1750_v37 = vadd.f32 -1.0, %v2152_v30  ;;  %vm1049_vm4 = vcmp.gt.f32.partialorder %v2635_v27, 0.0 }
 0x211   : > { %2163 = vpow2.f32 %v1088_v32  ;;  %v1064_v38 = vmin.f32 %v2639_v33, 0.0  ;;  %v1956_v39 = vpop.f32.mrb[14].mxu1  ;;  %v1121_v50 = vsel %vm1041_vm10, %v2599_v49, %v1751_v35  ;;  %vm1048_vm3 = vcmp.gt.f32.partialorder %v2639_v33, 0.0 }
 0x212   : > { %v2154_v41 = vpop.eup %2153  ;;  %v1094_v44 = vmul.f32 1.442695, %v1065_v36  ;;  %v2649_v45 = vadd.f32 %v1956_v39, %v2586_v31  ;;  %v1027_v40 = vpop.f32.mrb[15].mxu1  ;;  %v1120_v46 = vsel %vm1040_vm9, %v2602_v53, %v1750_v37 }
 0x213   : > { %v2156_v47 = vpop.eup %2155  ;;  %v1092_v42 = vmul.f32 1.442695, %v1064_v38  ;;  %v1028_v48 = vadd.f32 %v2586_v31, %v1027_v40  ;;  %1971 = vmatprep.mubr.msk.f32.mxu1 %vm842_vm2, %v1120_v46  ;;  %v1753_v51 = vadd.f32 -1.0, %v2154_v41 }
 0x214   : > { %2165 = vpow2.f32 %v1094_v44  ;;  %v1067_v54 = vmin.f32 %v2649_v45, 0.0  ;;  %1972 = vmatmul.mubr.msk.f32.gmra.mrb[20].mxu1 %vm842_vm2, %v1121_v50  ;;  %v1752_v55 = vadd.f32 -1.0, %v2156_v47  ;;  %vm1051_vm6 = vcmp.gt.f32.partialorder %v2649_v45, 0.0 }
 0x215   : > { %2167 = vpow2.f32 %v1092_v42  ;;  %v1066_v52 = vmin.f32 %v1028_v48, 0.0  ;;  %v1123_v49 = vsel %vm1043_vm12, %v2607_v57, %v1753_v51  ;;  %vm1050_vm5 = vcmp.gt.f32.partialorder %v1028_v48, 0.0 }
 0x216   : > { %v2158_v53 = vpop.eup %2157  ;;  %v1098_v56 = vmul.f32 1.442695, %v1067_v54  ;;  %v1122_v31 = vsel %vm1042_vm11, %v2610_v61, %v1752_v55 }
 0x217   : > { %v2160_v58 = vpop.eup %2159  ;;  %v1096_v59 = vmul.f32 1.442695, %v1066_v52  ;;  %1974 = vmatprep.mubr.msk.f32.mxu1 %vm842_vm2, %v1122_v31  ;;  %v1755_v62 = vadd.f32 -1.0, %v2158_v53 }
 0x218   : > { %2169 = vpow2.f32 %v1098_v56  ;;  %1975 = vmatmul.mubr.msk.f32.gmra.mrb[22].mxu1 %vm842_vm2, %v1123_v49  ;;  %v1754_v0 = vadd.f32 -1.0, %v2160_v58 }
 0x219   : > { %2171 = vpow2.f32 %v1096_v59  ;;  %v1125_v63 = vsel %vm1045_vm14, %v2615_v3, %v1755_v62 }
 0x21a   : > { %v2162_v1 = vpop.eup %2161  ;;  %v1124_v2 = vsel %vm1044_vm13, %v2618_v8, %v1754_v0 }
 0x21b   : > { %v2164_v61 = vpop.eup %2163  ;;  %1977 = vmatprep.mubr.msk.f32.mxu1 %vm842_vm2, %v1124_v2  ;;  %v1757_v43 = vadd.f32 -1.0, %v2162_v1 }
 0x21c   : > { %1978 = vmatmul.mubr.msk.f32.gmra.mrb[24].mxu1 %vm842_vm2, %v1125_v63  ;;  %v1756_v57 = vadd.f32 -1.0, %v2164_v61 }
 0x21d   : > { %v1127_v8 = vsel %vm1047_vm0, %v2623_v4, %v1757_v43 }
 0x21e   : > { %v2166_v5 = vpop.eup %2165  ;;  %v1126_v6 = vsel %vm1046_vm15, %v2626_v13, %v1756_v57 }
 0x21f   : > { %v2168_v60 = vpop.eup %2167  ;;  %1980 = vmatprep.mubr.msk.f32.mxu1 %vm842_vm2, %v1126_v6  ;;  %v1759_v9 = vadd.f32 -1.0, %v2166_v5 }
 0x220   : > { %1981 = vmatmul.mubr.msk.f32.gmra.mrb[26].mxu1 %vm842_vm2, %v1127_v8  ;;  %v1758_v3 = vadd.f32 -1.0, %v2168_v60 }
 0x221   : > { %v1129_v12 = vsel %vm1049_vm4, %v2635_v27, %v1759_v9 }
 0x222   : > { %v2170_v10 = vpop.eup %2169  ;;  %v1128_v11 = vsel %vm1048_vm3, %v2639_v33, %v1758_v3 }
 0x223   : > { %v2172_v7 = vpop.eup %2171  ;;  %1983 = vmatprep.mubr.msk.f32.mxu1 %vm842_vm2, %v1128_v11  ;;  %v1761_v14 = vadd.f32 -1.0, %v2170_v10 }
 0x224   : > { %1984 = vmatmul.mubr.msk.f32.gmra.mrb[28].mxu1 %vm842_vm2, %v1129_v12  ;;  %v1760_v4 = vadd.f32 -1.0, %v2172_v7 }
 0x225   : > { %v1131_v16 = vsel %vm1051_vm6, %v2649_v45, %v1761_v14 }
 0x226   : > { %v1130_v15 = vsel %vm1050_vm5, %v1028_v48, %v1760_v4 }
 0x227   : > { %1986 = vmatprep.mubr.msk.f32.mxu1 %vm842_vm2, %v1130_v15 }
 0x228   : > { %1987 = vmatmul.mubr.msk.f32.gmra.mrb[30].mxu1 %vm842_vm2, %v1131_v16 }
 0x2df   : > { %v1967_v17 = vpop.f32.mrb[16].mxu1 }
 0x2e0   : > { %v1261_v19 = vadd.f32 %v1967_v17, %v2688_v18  ;;  %v1255_v13 = vpop.f32.mrb[17].mxu1 }
 0x2e1   : > { %v1256_v20 = vadd.f32 %v2688_v18, %v1255_v13 }
 0x2e2   : > { %v1335_v21 = vmul.f32 0.5, %v1261_v19 }
 0x2e3   : > { %v1334_v22 = vmul.f32 0.5, %v1256_v20  ;;  %v1970_v23 = vpop.f32.mrb[18].mxu1 }
 0x2e4   : > { %2173 = vtanh.f32 %v1335_v21  ;;  %v1271_v24 = vadd.f32 %v1970_v23, %v2688_v18  ;;  %v1265_v25 = vpop.f32.mrb[19].mxu1 }
 0x2e5   : > { %2175 = vtanh.f32 %v1334_v22  ;;  %v1266_v26 = vadd.f32 %v2688_v18, %v1265_v25 }
 0x2e6   : > { %v1337_v27 = vmul.f32 0.5, %v1271_v24 }
 0x2e7   : > { %v1336_v28 = vmul.f32 0.5, %v1266_v26  ;;  %v1973_v29 = vpop.f32.mrb[20].mxu1 }
 0x2e8   : > { %2177 = vtanh.f32 %v1337_v27  ;;  %v1281_v30 = vadd.f32 %v1973_v29, %v2688_v18  ;;  %v1275_v32 = vpop.f32.mrb[21].mxu1 }
 0x2e9   : > { %2179 = vtanh.f32 %v1336_v28  ;;  %v1276_v33 = vadd.f32 %v2688_v18, %v1275_v32 }
 0x2ea   : > { %v1339_v34 = vmul.f32 0.5, %v1281_v30 }
 0x2eb   : > { %v1338_v35 = vmul.f32 0.5, %v1276_v33  ;;  %v1976_v36 = vpop.f32.mrb[22].mxu1 }
 0x2ec   : > { %2181 = vtanh.f32 %v1339_v34  ;;  %v1291_v37 = vadd.f32 %v1976_v36, %v2688_v18  ;;  %v1285_v38 = vpop.f32.mrb[23].mxu1 }
 0x2ed   : > { %2183 = vtanh.f32 %v1338_v35  ;;  %v1286_v39 = vadd.f32 %v2688_v18, %v1285_v38 }
 0x2ee   : > { %v2174_v41 = vpop.eup %2173  ;;  %v1341_v44 = vmul.f32 0.5, %v1291_v37 }
 0x2ef   : > { %v2176_v45 = vpop.eup %2175  ;;  %1367 = vst.msk [vmem:[%s2699_s18 + $0x8] sm:$0xff] %vm323_vm1, %v2174_v41  ;;  %v1340_v40 = vmul.f32 0.5, %v1286_v39  ;;  %v1979_v46 = vpop.f32.mrb[24].mxu1 }
 0x2f0   : > { %1366 = vst.msk [vmem:[%s2699_s18] sm:$0xff] %vm323_vm1, %v2176_v45  ;;  %2185 = vtanh.f32 %v1341_v44  ;;  %v1301_v47 = vadd.f32 %v1979_v46, %v2688_v18  ;;  %v1295_v42 = vpop.f32.mrb[25].mxu1 }
 0x2f1   : > { %2187 = vtanh.f32 %v1340_v40  ;;  %v1296_v48 = vadd.f32 %v2688_v18, %v1295_v42 }
 0x2f2   : > { %v2178_v50 = vpop.eup %2177  ;;  %v1343_v51 = vmul.f32 0.5, %v1301_v47 }
 0x2f3   : > { %v2180_v54 = vpop.eup %2179  ;;  %1369 = vst.msk [vmem:[%s2699_s18 + $0x18] sm:$0xff] %vm323_vm1, %v2178_v50  ;;  %v1342_v55 = vmul.f32 0.5, %v1296_v48  ;;  %v1982_v52 = vpop.f32.mrb[26].mxu1 }
 0x2f4   : > { %1368 = vst.msk [vmem:[%s2699_s18 + $0x10] sm:$0xff] %vm323_vm1, %v2180_v54  ;;  %2189 = vtanh.f32 %v1343_v51  ;;  %v1311_v53 = vadd.f32 %v1982_v52, %v2688_v18  ;;  %v1305_v56 = vpop.f32.mrb[27].mxu1 }
 0x2f5   : > { %2191 = vtanh.f32 %v1342_v55  ;;  %v1306_v31 = vadd.f32 %v2688_v18, %v1305_v56 }
 0x2f6   : > { %v2182_v58 = vpop.eup %2181  ;;  %v1345_v59 = vmul.f32 0.5, %v1311_v53 }
 0x2f7   : > { %v2184_v49 = vpop.eup %2183  ;;  %1371 = vst.msk [vmem:[%s2699_s18 + $0x28] sm:$0xff] %vm323_vm1, %v2182_v58  ;;  %v1344_v62 = vmul.f32 0.5, %v1306_v31  ;;  %v1985_v0 = vpop.f32.mrb[28].mxu1 }
 0x2f8   : > { %1370 = vst.msk [vmem:[%s2699_s18 + $0x20] sm:$0xff] %vm323_vm1, %v2184_v49  ;;  %2193 = vtanh.f32 %v1345_v59  ;;  %v1321_v1 = vadd.f32 %v1985_v0, %v2688_v18  ;;  %v1315_v2 = vpop.f32.mrb[29].mxu1 }
 0x2f9   : > { %2195 = vtanh.f32 %v1344_v62  ;;  %v1316_v61 = vadd.f32 %v2688_v18, %v1315_v2 }
 0x2fa   : > { %v2186_v63 = vpop.eup %2185  ;;  %v1347_v43 = vmul.f32 0.5, %v1321_v1 }
 0x2fb   : > { %v2188_v57 = vpop.eup %2187  ;;  %1373 = vst.msk [vmem:[%s2699_s18 + $0x38] sm:$0xff] %vm323_vm1, %v2186_v63  ;;  %v1346_v5 = vmul.f32 0.5, %v1316_v61  ;;  %v1988_v6 = vpop.f32.mrb[30].mxu1 }
 0x2fc   : > { %1372 = vst.msk [vmem:[%s2699_s18 + $0x30] sm:$0xff] %vm323_vm1, %v2188_v57  ;;  %2197 = vtanh.f32 %v1347_v43  ;;  %v1331_v60 = vadd.f32 %v1988_v6, %v2688_v18  ;;  %v1325_v8 = vpop.f32.mrb[31].mxu1 }
 0x2fd   : > { %2199 = vtanh.f32 %v1346_v5  ;;  %v1326_v9 = vadd.f32 %v2688_v18, %v1325_v8 }
 0x2fe   : > { %v2190_v3 = vpop.eup %2189  ;;  %v1349_v10 = vmul.f32 0.5, %v1331_v60 }
 0x2ff   : > { %v2192_v11 = vpop.eup %2191  ;;  %1375 = vst.msk [vmem:[%s2699_s18 + $0x48] sm:$0xff] %vm323_vm1, %v2190_v3  ;;  %v1348_v7 = vmul.f32 0.5, %v1326_v9 }
 0x300   : > { %1374 = vst.msk [vmem:[%s2699_s18 + $0x40] sm:$0xff] %vm323_vm1, %v2192_v11  ;;  %2201 = vtanh.f32 %v1349_v10 }
 0x301   : > { %2203 = vtanh.f32 %v1348_v7 }
 0x302   : > { %v2194_v12 = vpop.eup %2193 }
 0x303   : > { %v2196_v14 = vpop.eup %2195  ;;  %1377 = vst.msk [vmem:[%s2699_s18 + $0x58] sm:$0xff] %vm323_vm1, %v2194_v12 }
 0x304   : > { %1376 = vst.msk [vmem:[%s2699_s18 + $0x50] sm:$0xff] %vm323_vm1, %v2196_v14 }
 0x306   : > { %v2198_v4 = vpop.eup %2197  ;;  %1388 = sbr.rel (!%p2348_p4) target bundleno = 830 (0x33e), region = 44 }
 0x307   : > { %v2200_v15 = vpop.eup %2199  ;;  %1379 = vst.msk [vmem:[%s2699_s18 + $0x68] sm:$0xff] %vm323_vm1, %v2198_v4 }
 0x308   : > { %1378 = vst.msk [vmem:[%s2699_s18 + $0x60] sm:$0xff] %vm323_vm1, %v2200_v15 }
 0x30a   : > { %v2202_v16 = vpop.eup %2201 }
 0x30b   : > { %v2204_v18 = vpop.eup %2203  ;;  %1381 = vst.msk [vmem:[%s2699_s18 + $0x78] sm:$0xff] %vm323_vm1, %v2202_v16 }
 0x30c   : > { %1380 = vst.msk [vmem:[%s2699_s18 + $0x70] sm:$0xff] %vm323_vm1, %v2204_v18 }
 0x30d   : > { %s2855_s27 = smov (!%p1391_p8, %s1390_s27), 16 }
 0x30e   : > { %s1781_s8 = sshll.u32 %s2855_s27, 7 }
 0x30f   : > { %p1784_p9 = scmp.eq.s32.totalorder %s1781_s8, 0 }
 0x310   : > { %s2754_s9 = sshrl.u32 (!%p1784_p9), %s2855_s27, 4 }
 0x311   : > { %1399 = sbr.rel (%p1784_p9) target bundleno = 830 (0x33e), region = 48  ;;  %p1785_p10 = scmp.le.s32.totalorder (!%p1784_p9), %s2754_s9, 0 }
 0x318   : > { %1619 = sbr.rel (%p1785_p10) target bundleno = 809 (0x329), region = 127  ;;  %s2848_s21 = smov (!%p1785_p10), %s2748_s7 }
 0x319   : > { %s2849_s26 = smov (!%p1785_p10), %s2699_s18  ;;  %s2763_s29 = smov (!%p1785_p10), 0  }
 0x31a   : > { %s2765_s10 = smov (!%p1785_p10), 0  }
 0x31f LB: >> { %v1491_v17 = vld [vmem:[%s2267_s26] sm:$0xff]  ;;  %v1493_v19 = vld [vmem:[%s2267_s26 + $0x8] sm:$0xff]  ;;  %v1495_v13 = vld [vmem:[%s2267_s26 + $0x10] sm:$0xff]  ;;  %s1523_s11 = sadd.s32 1, %s2271_s29  ;;  %s1485_s10 = sadd.s32 1, %s2275_s10   ;;  %s2275_s10 = sphi %s2765_s10, %s1485_s10   ;;  %s2271_s29 = sphi %s2763_s29, %s2850_s29   ;;  %s2267_s26 = sphi %s2849_s26, %s1528_s26   ;;  %s2263_s21 = sphi %s2848_s21, %s1529_s21  }
 0x320   : >> { %1492 = vst [vmem:[%s2263_s21] sm:$0xff] %v1491_v17  ;;  %1494 = vst [vmem:[%s2263_s21 + $0x8] sm:$0xff] %v1493_v19  ;;  %v1497_v20 = vld [vmem:[%s2267_s26 + $0x18] sm:$0xff]  ;;  %v1499_v21 = vld [vmem:[%s2267_s26 + $0x20] sm:$0xff]  ;;  %p1524_p11 = scmp.ge.s32.totalorder %s1523_s11, %s2754_s9  ;;  %p1484_p12 = scmp.ge.s32.totalorder %s1485_s10, %s2754_s9 }
 0x321   : >> { %1496 = vst [vmem:[%s2263_s21 + $0x10] sm:$0xff] %v1495_v13  ;;  %v1501_v22 = vld [vmem:[%s2267_s26 + $0x28] sm:$0xff]  ;;  %1498 = vst [vmem:[%s2263_s21 + $0x18] sm:$0xff] %v1497_v20  ;;  %v1503_v23 = vld [vmem:[%s2267_s26 + $0x30] sm:$0xff] }
 0x322   : >> { %1500 = vst [vmem:[%s2263_s21 + $0x20] sm:$0xff] %v1499_v21  ;;  %1502 = vst [vmem:[%s2263_s21 + $0x28] sm:$0xff] %v1501_v22  ;;  %v1505_v24 = vld [vmem:[%s2267_s26 + $0x38] sm:$0xff]  ;;  %v1507_v25 = vld [vmem:[%s2267_s26 + $0x40] sm:$0xff]  ;;  %s2857_s11 = smov (%p1524_p11, %s1523_s11), 0  ;;  %1487 = sbr.rel (!%p1484_p12) target bundleno = 799 (0x31f), region = 133 }
 0x323   : >> { %1504 = vst [vmem:[%s2263_s21 + $0x30] sm:$0xff] %v1503_v23  ;;  %1506 = vst [vmem:[%s2263_s21 + $0x38] sm:$0xff] %v1505_v24  ;;  %v1509_v26 = vld [vmem:[%s2267_s26 + $0x48] sm:$0xff]  ;;  %v1511_v27 = vld [vmem:[%s2267_s26 + $0x50] sm:$0xff]  ;;  %s1786_s12 = sshll.u32 %s2857_s11, 7  ;;  %s2850_s29 = smov %s2857_s11 }
 0x324   : >> { %1508 = vst [vmem:[%s2263_s21 + $0x40] sm:$0xff] %v1507_v25  ;;  %v1513_v28 = vld [vmem:[%s2267_s26 + $0x58] sm:$0xff]  ;;  %1510 = vst [vmem:[%s2263_s21 + $0x48] sm:$0xff] %v1509_v26  ;;  %v1515_v29 = vld [vmem:[%s2267_s26 + $0x60] sm:$0xff] }
 0x325   : >> { %1512 = vst [vmem:[%s2263_s21 + $0x50] sm:$0xff] %v1511_v27  ;;  %1514 = vst [vmem:[%s2263_s21 + $0x58] sm:$0xff] %v1513_v28  ;;  %v1517_v30 = vld [vmem:[%s2267_s26 + $0x68] sm:$0xff]  ;;  %v1519_v32 = vld [vmem:[%s2267_s26 + $0x70] sm:$0xff] }
 0x326   : >> { %1516 = vst [vmem:[%s2263_s21 + $0x60] sm:$0xff] %v1515_v29  ;;  %1518 = vst [vmem:[%s2263_s21 + $0x68] sm:$0xff] %v1517_v30  ;;  %v1521_v33 = vld [vmem:[%s2267_s26 + $0x78] sm:$0xff]  ;;  %s1528_s26 = scalar_lea.vmem %s2699_s18, %s1786_s12 [#allocation2]  }
 0x327   : >> { %1520 = vst [vmem:[%s2263_s21 + $0x70] sm:$0xff] %v1519_v32  ;;  %1522 = vst [vmem:[%s2263_s21 + $0x78] sm:$0xff] %v1521_v33  ;;  %s1529_s21 = scalar_lea.vmem %s2748_s7, %s1786_s12  }
 0x329 PF: > { %s2823_s13 = sand.u32 15, %s2855_s27   ;;  %s1797_s14 = sshll.u32 %s2754_s9, 7 }
 0x32a   : > { %s1534_s15 = scalar_lea.vmem %s2699_s18, %s1797_s14 [#allocation2]   ;;  %s1536_s16 = scalar_lea.vmem %s2748_s7, %s1797_s14  }
 0x32b   : > { %p1791_p13 = scmp.le.s32.totalorder %s2823_s13, 0 }
 0x32c   : > { %s2277_s17 = smov (!%p1791_p13), %s1536_s16   ;;  %s2281_s20 = smov (!%p1791_p13), %s1534_s15  }
 0x32d   : > { %1633 = sbr.rel (%p1791_p13) target bundleno = 830 (0x33e), region = 138  ;;  %s2285_s23 = smov (!%p1791_p13), 0  }
 0x32e   : > { %s2289_s24 = smov (!%p1791_p13), 0  }
 0x334 LB: >> { %v1546_v34 = vld [vmem:[%s2283_s20] sm:$0xff]  ;;  %s1548_s27 = sadd.s32 1, %s2287_s23  ;;  %s1540_s24 = sadd.s32 1, %s2291_s24   ;;  %s2291_s24 = sphi %s2289_s24, %s1540_s24   ;;  %s2287_s23 = sphi %s2285_s23, %s2286_s23   ;;  %s2283_s20 = sphi %s2281_s20, %s1553_s20   ;;  %s2279_s17 = sphi %s2277_s17, %s1554_s17  }
 0x335   : >> { %1547 = vst [vmem:[%s2279_s17] sm:$0xff] %v1546_v34  ;;  %p1549_p0 = scmp.ge.s32.totalorder %s1548_s27, %s2823_s13  ;;  %p1539_p1 = scmp.ge.s32.totalorder %s1540_s24, %s2823_s13 }
 0x337   : >> { %s2859_s27 = smov (%p1549_p0, %s1548_s27), 0  ;;  %1542 = sbr.rel (!%p1539_p1) target bundleno = 820 (0x334), region = 144 }
 0x338   : >> { %s1792_s18 = sshll.u32 %s2859_s27, 3  ;;  %s2286_s23 = smov %s2859_s27  }
 0x339   : >> { %s1553_s20 = scalar_lea.vmem %s1534_s15, %s1792_s18 [#allocation2]   ;;  %s1554_s17 = scalar_lea.vmem %s1536_s16, %s1792_s18  }
 0x33e PF: > { %p12_p2 = scmp.ge.s32.totalorder %s2338_s22, 4   ;;  %s2851_s18 = smov %s2255_s19 }
 0x33f   : > { %s2852_s19 = smov %s2346_s25  ;;  %s2853_s20 = smov %s2338_s22 }
 0x340   :  { %14 = sbr.rel (!%p12_p2) target bundleno = 2 (0x2), region = 155 }

</bundles_post_ra>
